<compile_context>
chip_gen: v6e
topology: v6e:2x2x1
jax: 0.10.0
libtpu: 0.0.40
codegen_flags: <defaults>
</compile_context>

<pallas_src>
import functools

import jax
import jax.numpy as jnp
from jax.experimental import pallas as pl
from jax.experimental.pallas import tpu as pltpu


def _round_up(x, m):
    return (x + m - 1) // m * m


def _matmul_kernel(a_ref, b_ref, o_ref, acc_ref):
    """One (tile_m, tile_k) @ (tile_k, f_pad) MXU step with f32 accumulation."""
    k = pl.program_id(1)

    @pl.when(k == 0)
    def _init():
        acc_ref[...] = jnp.zeros_like(acc_ref)

    acc_ref[...] += jnp.dot(
        a_ref[...], b_ref[...], preferred_element_type=jnp.float32
    )

    @pl.when(k == pl.num_programs(1) - 1)
    def _store():
        o_ref[...] = acc_ref[...].astype(o_ref.dtype)


def _vmem_budget_bytes():
    try:
        cap = pltpu.get_tpu_info().vmem_capacity_bytes
    except Exception:
        cap = 64 * 1024 * 1024  # conservative fallback (v7x per-TC VMEM)
    return cap // 2  # leave headroom for Pallas internals / other buffers


def _tiled_matmul(a, b, *, tile_m, tile_k, out_dtype):
    """o = a @ b via a K-tiled Pallas kernel. a:(M,K), b:(K,F) -> (M,F)."""
    m, kdim = a.shape
    k2, f = b.shape
    assert kdim == k2

    f_pad = _round_up(max(f, 128), 128)          # lane-dense rhs/output
    tile_m = min(tile_m, _round_up(m, 8))        # sublane-aligned row tile
    tile_k = min(tile_k, _round_up(kdim, 128))   # lane-aligned K tile

    in_itm = jnp.dtype(a.dtype).itemsize
    out_itm = jnp.dtype(out_dtype).itemsize

    def vmem_need(tm, tk):
        return (2 * tm * tk * in_itm            # a tile, double-buffered
                + 2 * tk * f_pad * in_itm       # b tile, double-buffered
                + 2 * tm * f_pad * out_itm      # out tile, double-buffered
                + tm * f_pad * 4)               # f32 accumulator scratch

    budget = _vmem_budget_bytes()
    while tile_k > 128 and vmem_need(tile_m, tile_k) > budget:
        tile_k //= 2
    while tile_m > 8 and vmem_need(tile_m, tile_k) > budget:
        tile_m //= 2

    m_pad = _round_up(m, tile_m)
    k_pad = _round_up(kdim, tile_k)

    # Zero-pad so every block is full; zeros are exact for the matmul.
    if (m_pad, k_pad) != (m, kdim):
        a = jnp.pad(a, ((0, m_pad - m), (0, k_pad - kdim)))
    if (k_pad, f_pad) != (k2, f):
        b = jnp.pad(b, ((0, k_pad - k2), (0, f_pad - f)))

    grid = (m_pad // tile_m, k_pad // tile_k)

    cost = pl.CostEstimate(
        flops=2 * m_pad * k_pad * f_pad,
        transcendentals=0,
        bytes_accessed=(m_pad * k_pad * in_itm
                        + k_pad * f_pad * in_itm
                        + m_pad * f_pad * out_itm),
    )

    vmem_limit = int(min(60 * 2**20,
                         max(32 * 2**20, 2 * vmem_need(tile_m, tile_k))))

    out = pl.pallas_call(
        _matmul_kernel,
        out_shape=jax.ShapeDtypeStruct((m_pad, f_pad), out_dtype),
        grid_spec=pltpu.PrefetchScalarGridSpec(
            num_scalar_prefetch=0,
            grid=grid,
            in_specs=[
                pl.BlockSpec((tile_m, tile_k), lambda i, k: (i, k)),
                pl.BlockSpec((tile_k, f_pad), lambda i, k: (k, 0)),
            ],
            out_specs=pl.BlockSpec((tile_m, f_pad), lambda i, k: (i, 0)),
            scratch_shapes=[pltpu.VMEM((tile_m, f_pad), jnp.float32)],
        ),
        compiler_params=pltpu.CompilerParams(
            dimension_semantics=("parallel", "arbitrary"),
            vmem_limit_bytes=vmem_limit,
        ),
        cost_estimate=cost,
    )(a, b)

    return out[:m, :f]


@functools.partial(jax.jit,
                   static_argnames=("tile_m", "tile_k", "compute_dtype"))
def dist_gconv_forward(x, weight, adj, *, tile_m=256, tile_k=1024,
                       compute_dtype=jnp.bfloat16):
    """Z = (adj @ x) @ weight  ==  adj @ (x @ weight)   (world_size == 1)."""
    n, f_in = x.shape
    f_out = weight.shape[1]
    assert adj.shape == (n, n)
    assert weight.shape[0] == f_in

    adj_c = adj.astype(compute_dtype)
    if f_out <= f_in:
        # Reassociate: tiny X @ W in the wrapper, big A @ (XW) in Pallas.
        rhs = jnp.dot(x, weight, preferred_element_type=jnp.float32,
                      precision=jax.lax.Precision.HIGHEST).astype(compute_dtype)
        return _tiled_matmul(adj_c, rhs, tile_m=tile_m, tile_k=tile_k,
                             out_dtype=jnp.float32)
    else:
        t = _tiled_matmul(adj_c, x.astype(compute_dtype),
                          tile_m=tile_m, tile_k=tile_k, out_dtype=jnp.float32)
        return jnp.dot(t, weight, preferred_element_type=jnp.float32,
                       precision=jax.lax.Precision.HIGHEST)


class DistGConv:
    """JAX/Pallas analogue of the PyTorch DistGConv module (world_size=1)."""

    def __init__(self, input_dim, output_dim, rank=0, *, key=None):
        self.input_dim = input_dim
        self.output_dim = output_dim
        self.rank = rank
        if key is None:
            key = jax.random.PRNGKey(0)
        # torch.rand(input_dim, output_dim) -> uniform [0, 1)
        self.weight = jax.random.uniform(
            key, (input_dim, output_dim), dtype=jnp.float32
        )

    def __call__(self, x, adj):
        return dist_gconv_forward(x, self.weight, adj)


if __name__ == "__main__":
    # Small deterministic example: N nodes, F_in -> F_out features.
    N, F_IN, F_OUT = 512, 64, 32

    root = jax.random.PRNGKey(0)
    k_x, k_adj, k_w = jax.random.split(root, 3)

    x = jax.random.normal(k_x, (N, F_IN), dtype=jnp.float32)
    # Dense "adjacency": row-normalized non-negative random matrix.
    adj_raw = jax.random.uniform(k_adj, (N, N), dtype=jnp.float32)
    adj = adj_raw / jnp.sum(adj_raw, axis=1, keepdims=True)

    layer = DistGConv(F_IN, F_OUT, rank=0, key=k_w)

    z = jax.block_until_ready(layer(x, adj))
    assert z.shape == (N, F_OUT)
    assert z.dtype == jnp.float32

    # Reference at matching precision (bf16 operands, f32 accumulation).
    xw = jnp.dot(x, layer.weight, preferred_element_type=jnp.float32,
                 precision=jax.lax.Precision.HIGHEST)
    z_ref = jnp.dot(adj.astype(jnp.bfloat16).astype(jnp.float32),
                    xw.astype(jnp.bfloat16).astype(jnp.float32),
                    precision=jax.lax.Precision.HIGHEST)
    assert jnp.allclose(z, z_ref, atol=1e-3, rtol=1e-3), "mismatch vs reference"

    # Loose sanity check against full-f32 math (bf16 cast error only).
    z_f32 = jnp.dot(adj, xw, precision=jax.lax.Precision.HIGHEST)
    assert float(jnp.max(jnp.abs(z - z_f32))) < 5e-2, "bf16 error too large"

    print("KERNEL_OK")
</pallas_src>

<mosaic_0001>
module attributes {stable_mosaic.version = 11 : i64} {
  func.func @_matmul_kernel(%arg0: i32, %arg1: i32, %arg2: memref<256x512xbf16, #tpu.memory_space<vmem>>, %arg3: memref<512x128xbf16, #tpu.memory_space<vmem>>, %arg4: memref<256x128xf32, #tpu.memory_space<vmem>>, %arg5: memref<256x128xf32, #tpu.memory_space<vmem>>) attributes {dimension_semantics = [#tpu.dimension_semantics<parallel>, #tpu.dimension_semantics<arbitrary>], iteration_bounds = array<i64: 2, 1>, scalar_prefetch = 0 : i64, scratch_operands = 1 : i64, tpu.core_type = #tpu.core_type<tc>, window_params = [{transform_indices = @transform_0, window_bounds = array<i64: 256, 512>}, {transform_indices = @transform_1, window_bounds = array<i64: 512, 128>}, {transform_indices = @transform_2, window_bounds = array<i64: 256, 128>}]} {
    %c0_i32 = arith.constant 0 : i32
    %0 = arith.cmpi eq, %arg1, %c0_i32 : i32
    %1 = arith.extui %0 : i1 to i32
    %c0_i32_0 = arith.constant 0 : i32
    %2 = arith.cmpi ne, %1, %c0_i32_0 : i32
    scf.if %2 {
      %cst_10 = arith.constant 0.000000e+00 : f32
      %12 = vector.broadcast %cst_10 : f32 to vector<256x128xf32>
      %c0_11 = arith.constant 0 : index
      %c0_12 = arith.constant 0 : index
      %13 = vector.load %arg5[%c0_11, %c0_12] : memref<256x128xf32, #tpu.memory_space<vmem>>, vector<256x128xf32>
      tpu.vector_store %arg5[%c0_11, %c0_12], %12 {strides = array<i32>} : memref<256x128xf32, #tpu.memory_space<vmem>>, vector<256x128xf32>,
    } else {
    }
    %c0 = arith.constant 0 : index
    %c0_1 = arith.constant 0 : index
    %3 = vector.load %arg5[%c0, %c0_1] : memref<256x128xf32, #tpu.memory_space<vmem>>, vector<256x128xf32>
    %c0_2 = arith.constant 0 : index
    %c0_3 = arith.constant 0 : index
    %4 = vector.load %arg2[%c0_2, %c0_3] : memref<256x512xbf16, #tpu.memory_space<vmem>>, vector<256x512xbf16>
    %c0_4 = arith.constant 0 : index
    %c0_5 = arith.constant 0 : index
    %5 = vector.load %arg3[%c0_4, %c0_5] : memref<512x128xbf16, #tpu.memory_space<vmem>>, vector<512x128xbf16>
    %cst = arith.constant dense<0.000000e+00> : vector<256x128xf32>
    %6 = tpu.matmul %4, %5, %cst {dimension_numbers = #tpu.dot_dimension_numbers<[1], [0], [0], [1], [0, 0, 1, 1], [], []>} : vector<256x512xbf16>, vector<512x128xbf16>, vector<256x128xf32> -> vector<256x128xf32>
    %7 = arith.addf %3, %6 : vector<256x128xf32>
    %c0_6 = arith.constant 0 : index
    %c0_7 = arith.constant 0 : index
    %8 = vector.load %arg5[%c0_6, %c0_7] : memref<256x128xf32, #tpu.memory_space<vmem>>, vector<256x128xf32>
    tpu.vector_store %arg5[%c0_6, %c0_7], %7 {strides = array<i32>} : memref<256x128xf32, #tpu.memory_space<vmem>>, vector<256x128xf32>,
    %c0_i32_8 = arith.constant 0 : i32
    %9 = arith.cmpi eq, %arg1, %c0_i32_8 : i32
    %10 = arith.extui %9 : i1 to i32
    %c0_i32_9 = arith.constant 0 : i32
    %11 = arith.cmpi ne, %10, %c0_i32_9 : i32
    scf.if %11 {
      %c0_10 = arith.constant 0 : index
      %c0_11 = arith.constant 0 : index
      %12 = vector.load %arg5[%c0_10, %c0_11] : memref<256x128xf32, #tpu.memory_space<vmem>>, vector<256x128xf32>
      %c0_12 = arith.constant 0 : index
      %c0_13 = arith.constant 0 : index
      %13 = vector.load %arg4[%c0_12, %c0_13] : memref<256x128xf32, #tpu.memory_space<vmem>>, vector<256x128xf32>
      tpu.vector_store %arg4[%c0_12, %c0_13], %12 {strides = array<i32>} : memref<256x128xf32, #tpu.memory_space<vmem>>, vector<256x128xf32>,
    } else {
    }
    return
  }
  func.func @transform_0(%arg0: i32, %arg1: i32) -> (i32, i32) {
    %c0_i32 = arith.constant 0 : i32
    return %arg0, %arg1 : i32, i32
  }
  func.func @transform_1(%arg0: i32, %arg1: i32) -> (i32, i32) {
    %c0_i32 = arith.constant 0 : i32
    %c0_i32_0 = arith.constant 0 : i32
    return %arg1, %c0_i32 : i32, i32
  }
  func.func @transform_2(%arg0: i32, %arg1: i32) -> (i32, i32) {
    %c0_i32 = arith.constant 0 : i32
    %c0_i32_0 = arith.constant 0 : i32
    return %arg0, %c0_i32 : i32, i32
  }
}

</mosaic_0001>

<bundles_post_ra>
// kernel: dist_gconv_forward.1
= control target key start
LH: loop header
LB: loop body
LE: loop exit
PB: predicated region body
PF: predicated region fallthrough
CT: control target
= control target key end

     0   :  { %s1973_s9 = smov 0   ;;  %s1975_s10 = smov 0   ;;  %s2209_s0 = inlined_call_operand.vmem [shape: bf16[512,512], index: 0, kind: input, shape index: {}]   ;;  %s2210_s1 = inlined_call_operand.vmem [shape: bf16[512,128], index: 1, kind: input, shape index: {}]   ;;  %s2211_s2 = inlined_call_operand.vmem [shape: f32[512,128], index: 2, kind: output, shape index: {}]  }
   0x1   :  { %s1977_s11 = smov 0  }
   0x2 LB: > { %s24_s12 = sadd.s32 1, %s1952_s10  ;;  %p1453_p0 = scmp.ge.s32.totalorder %s1956_s11, 1  ;;  %s1956_s11 = sphi %s1977_s11, %s12_s11   ;;  %s1952_s10 = sphi %s1975_s10, %s2213_s10   ;;  %s1948_s9 = sphi %s1973_s9, %s2212_s9  }
   0x3   : > { %p26_p1 = scmp.ge.s32.totalorder %s24_s12, 2  ;;  %p144_p2 = scmp.lt.s32.totalorder %s1956_s11, 3 }
   0x5   : > { %s2215_s12 = smov (%p26_p1, %s24_s12), 0  ;;  %p145_p3 = pnand %p1453_p0, %p144_p2 }
   0x6   : > { %s1454_s21 = sshll.u32 (!%p145_p3), %s1948_s9, 5 }
   0x7   : > { %148 = sbr.rel (%p145_p3) target bundleno = 371 (0x173), region = 28  ;;  %p178_p4 = scmp.lt.s32.totalorder (!%p145_p3), %s1454_s21, 63 }
   0xc   : > { %v1806_v0 = vld [vmem:[%s2210_s1 + $0x78] sm:$0xff]   ;;  %v1810_v4 = vld [vmem:[%s2210_s1 + $0x70] sm:$0xff]   ;;  %v1814_v8 = vld [vmem:[%s2210_s1 + $0x68] sm:$0xff]   ;;  %s2217_s21 = smov (!%p178_p4, %s1454_s21), 63 }
   0xd   : > { %v1807_v1 = vld [vmem:[%s2210_s1 + $0xf8] sm:$0xff]   ;;  %1558 = vmatprep.subr.bf16.mxu0 %v1806_v0  ;;  %v1811_v5 = vld [vmem:[%s2210_s1 + $0xf0] sm:$0xff]   ;;  %v1815_v9 = vld [vmem:[%s2210_s1 + $0xe8] sm:$0xff]   ;;  %s1557_s19 = sshll.u32 %s2217_s21, 4  ;;  %s1458_s5 = sshll.u32 %s2217_s21, 3 }
   0xe   : > { %v1808_v2 = vld [vmem:[%s2210_s1 + $0x38] sm:$0xff]   ;;  %1670 = vmatprep.subr.bf16.mxu1 %v1807_v1  ;;  %v1812_v6 = vld [vmem:[%s2210_s1 + $0x30] sm:$0xff]   ;;  %v1816_v10 = vld [vmem:[%s2210_s1 + $0x28] sm:$0xff]   ;;  %s2090_s29 = scalar_lea.vmem %s2209_s0, %s1557_s19  ;;  %s2166_s8 = scalar_lea.vmem %s2211_s2, %s1458_s5 }
   0xf   : > { %v1809_v3 = vld [vmem:[%s2210_s1 + $0xb8] sm:$0xff]   ;;  %1559 = vmatpush3.bf16.msra.mxu0 %v1808_v2  ;;  %v1813_v7 = vld [vmem:[%s2210_s1 + $0xb0] sm:$0xff]   ;;  %v1817_v11 = vld [vmem:[%s2210_s1 + $0xa8] sm:$0xff]  }
  0x10   : > { %1671 = vmatpush3.bf16.msra.mxu1 %v1809_v3  ;;  %1560 = vmatprep.subr.bf16.mxu0 %v1810_v4  ;;  %v1818_v12 = vld [vmem:[%s2210_s1 + $0x60] sm:$0xff]   ;;  %v1822_v16 = vld [vmem:[%s2210_s1 + $0x58] sm:$0xff]   ;;  %v1826_v20 = vld [vmem:[%s2210_s1 + $0x50] sm:$0xff]  }
  0x11   : > { %1672 = vmatprep.subr.bf16.mxu1 %v1811_v5  ;;  %v1819_v13 = vld [vmem:[%s2210_s1 + $0xe0] sm:$0xff]   ;;  %v1823_v17 = vld [vmem:[%s2210_s1 + $0xd8] sm:$0xff]   ;;  %v1827_v21 = vld [vmem:[%s2210_s1 + $0xd0] sm:$0xff]  }
  0x12   : > { %v1820_v14 = vld [vmem:[%s2210_s1 + $0x20] sm:$0xff]   ;;  %v1824_v18 = vld [vmem:[%s2210_s1 + $0x18] sm:$0xff]   ;;  %v1828_v22 = vld [vmem:[%s2210_s1 + $0x10] sm:$0xff]  }
  0x13   : > { %1561 = vmatpush3.bf16.msra.mxu0 %v1812_v6  ;;  %v1821_v15 = vld [vmem:[%s2210_s1 + $0xa0] sm:$0xff]   ;;  %v1825_v19 = vld [vmem:[%s2210_s1 + $0x98] sm:$0xff]   ;;  %v1829_v23 = vld [vmem:[%s2210_s1 + $0x90] sm:$0xff]  }
  0x14   : > { %1673 = vmatpush3.bf16.msra.mxu1 %v1813_v7  ;;  %1562 = vmatprep.subr.bf16.mxu0 %v1814_v8  ;;  %v1830_v24 = vld [vmem:[%s2210_s1 + $0x48] sm:$0xff]   ;;  %v1834_v28 = vld [vmem:[%s2210_s1 + $0x40] sm:$0xff]  }
  0x15   : > { %1674 = vmatprep.subr.bf16.mxu1 %v1815_v9  ;;  %v1831_v25 = vld [vmem:[%s2210_s1 + $0xc8] sm:$0xff]   ;;  %v1835_v29 = vld [vmem:[%s2210_s1 + $0xc0] sm:$0xff]  }
  0x16   : > { %v1832_v26 = vld [vmem:[%s2210_s1 + $0x8] sm:$0xff]   ;;  %v1836_v30 = vld [vmem:[%s2210_s1] sm:$0xff]  }
  0x17   : > { %1563 = vmatpush3.bf16.msra.mxu0 %v1816_v10  ;;  %v1833_v27 = vld [vmem:[%s2210_s1 + $0x88] sm:$0xff]   ;;  %v1837_v31 = vld [vmem:[%s2210_s1 + $0x80] sm:$0xff]  }
  0x18   : > { %1675 = vmatpush3.bf16.msra.mxu1 %v1817_v11  ;;  %1564 = vmatprep.subr.bf16.mxu0 %v1818_v12  ;;  %v1838_v32 = vld [vmem:[%s2090_s29] ss:$16 sps:$4 sm:$0xff]   ;;  %v1840_v33 = vld [vmem:[%s2090_s29 + $0x4] ss:$16 sps:$4 sm:$0xff]   ;;  %v1841_v34 = vld [vmem:[%s2090_s29 + $0x8] ss:$16 sps:$4 sm:$0xff]  }
  0x19   : > { %1676 = vmatprep.subr.bf16.mxu1 %v1819_v13  ;;  %v1843_v35 = vld [vmem:[%s2090_s29 + $0xc] ss:$16 sps:$4 sm:$0xff]   ;;  %941 = vmatprep.mubr.bf16.mxu0 %v1840_v33  ;;  %v1844_v36 = vld [vmem:[%s2090_s29 + $0x24] ss:$16 sps:$4 sm:$0xff]   ;;  %v1848_v38 = vld [vmem:[%s2090_s29 + $0x20] ss:$16 sps:$4 sm:$0xff]  }
  0x1a   : > { %1102 = vmatprep.mubr.bf16.mxu1 %v1843_v35  ;;  %v1846_v37 = vld [vmem:[%s2090_s29 + $0x2c] ss:$16 sps:$4 sm:$0xff]   ;;  %v1849_v39 = vld [vmem:[%s2090_s29 + $0x28] ss:$16 sps:$4 sm:$0xff]   ;;  %v1850_v40 = vld [vmem:[%s2090_s29 + $0x44] ss:$16 sps:$4 sm:$0xff]  }
  0x1b   : > { %1565 = vmatpush3.bf16.msra.mxu0 %v1820_v14  ;;  %v1852_v41 = vld [vmem:[%s2090_s29 + $0x4c] ss:$16 sps:$4 sm:$0xff]   ;;  %v1854_v42 = vld [vmem:[%s2090_s29 + $0x40] ss:$16 sps:$4 sm:$0xff]   ;;  %v1855_v43 = vld [vmem:[%s2090_s29 + $0x48] ss:$16 sps:$4 sm:$0xff]  }
  0x1c   : > { %1677 = vmatpush3.bf16.msra.mxu1 %v1821_v15  ;;  %1566 = vmatprep.subr.bf16.mxu0 %v1822_v16  ;;  %v1856_v44 = vld [vmem:[%s2090_s29 + $0x64] ss:$16 sps:$4 sm:$0xff]   ;;  %v1858_v45 = vld [vmem:[%s2090_s29 + $0x6c] ss:$16 sps:$4 sm:$0xff]   ;;  %v1860_v46 = vld [vmem:[%s2090_s29 + $0x60] ss:$16 sps:$4 sm:$0xff]  }
  0x1d   : > { %1678 = vmatprep.subr.bf16.mxu1 %v1823_v17  ;;  %v1861_v47 = vld [vmem:[%s2090_s29 + $0x68] ss:$16 sps:$4 sm:$0xff]   ;;  %v1862_v48 = vld [vmem:[%s2090_s29 + $0x84] ss:$16 sps:$4 sm:$0xff]   ;;  %v1864_v49 = vld [vmem:[%s2090_s29 + $0x8c] ss:$16 sps:$4 sm:$0xff]  }
  0x1e   : > { %v1866_v50 = vld [vmem:[%s2090_s29 + $0x80] ss:$16 sps:$4 sm:$0xff]   ;;  %v1867_v51 = vld [vmem:[%s2090_s29 + $0x88] ss:$16 sps:$4 sm:$0xff]   ;;  %v1868_v52 = vld [vmem:[%s2090_s29 + $0xa4] ss:$16 sps:$4 sm:$0xff]  }
  0x1f   : > { %1567 = vmatpush3.bf16.msra.mxu0 %v1824_v18  ;;  %v1870_v53 = vld [vmem:[%s2090_s29 + $0xac] ss:$16 sps:$4 sm:$0xff]   ;;  %v1872_v54 = vld [vmem:[%s2090_s29 + $0xa0] ss:$16 sps:$4 sm:$0xff]   ;;  %v1873_v55 = vld [vmem:[%s2090_s29 + $0xa8] ss:$16 sps:$4 sm:$0xff]  }
  0x20   : > { %1679 = vmatpush3.bf16.msra.mxu1 %v1825_v19  ;;  %1568 = vmatprep.subr.bf16.mxu0 %v1826_v20  ;;  %v1874_v56 = vld [vmem:[%s2090_s29 + $0xc4] ss:$16 sps:$4 sm:$0xff]   ;;  %v1876_v57 = vld [vmem:[%s2090_s29 + $0xcc] ss:$16 sps:$4 sm:$0xff]   ;;  %v1878_v58 = vld [vmem:[%s2090_s29 + $0xc0] ss:$16 sps:$4 sm:$0xff]  }
  0x21   : > { %1680 = vmatprep.subr.bf16.mxu1 %v1827_v21  ;;  %v1879_v59 = vld [vmem:[%s2090_s29 + $0xc8] ss:$16 sps:$4 sm:$0xff]   ;;  %v1880_v60 = vld [vmem:[%s2090_s29 + $0xe4] ss:$16 sps:$4 sm:$0xff]   ;;  %v1882_v61 = vld [vmem:[%s2090_s29 + $0xec] ss:$16 sps:$4 sm:$0xff]  }
  0x22   : > { %v1884_v62 = vld [vmem:[%s2090_s29 + $0xe0] ss:$16 sps:$4 sm:$0xff]   ;;  %v1885_v63 = vld [vmem:[%s2090_s29 + $0xe8] ss:$16 sps:$4 sm:$0xff]   ;;  %v1886_v0 = vld [vmem:[%s2090_s29 + $0x104] ss:$16 sps:$4 sm:$0xff]  }
  0x23   : > { %1569 = vmatpush3.bf16.msra.mxu0 %v1828_v22  ;;  %v1888_v1 = vld [vmem:[%s2090_s29 + $0x10c] ss:$16 sps:$4 sm:$0xff]   ;;  %v1890_v2 = vld [vmem:[%s2090_s29 + $0x100] ss:$16 sps:$4 sm:$0xff]   ;;  %v1891_v3 = vld [vmem:[%s2090_s29 + $0x108] ss:$16 sps:$4 sm:$0xff]  }
  0x24   : > { %1681 = vmatpush3.bf16.msra.mxu1 %v1829_v23  ;;  %1570 = vmatprep.subr.bf16.mxu0 %v1830_v24  ;;  %v1892_v4 = vld [vmem:[%s2090_s29 + $0x124] ss:$16 sps:$4 sm:$0xff]   ;;  %v1894_v5 = vld [vmem:[%s2090_s29 + $0x12c] ss:$16 sps:$4 sm:$0xff]   ;;  %v1896_v6 = vld [vmem:[%s2090_s29 + $0x120] ss:$16 sps:$4 sm:$0xff]  }
  0x25   : > { %1682 = vmatprep.subr.bf16.mxu1 %v1831_v25  ;;  %v1897_v7 = vld [vmem:[%s2090_s29 + $0x128] ss:$16 sps:$4 sm:$0xff]   ;;  %v1898_v8 = vld [vmem:[%s2090_s29 + $0x144] ss:$16 sps:$4 sm:$0xff]   ;;  %v1900_v9 = vld [vmem:[%s2090_s29 + $0x14c] ss:$16 sps:$4 sm:$0xff]  }
  0x26   : > { %v1902_v10 = vld [vmem:[%s2090_s29 + $0x140] ss:$16 sps:$4 sm:$0xff]   ;;  %v1903_v11 = vld [vmem:[%s2090_s29 + $0x148] ss:$16 sps:$4 sm:$0xff]   ;;  %v1904_v12 = vld [vmem:[%s2090_s29 + $0x164] ss:$16 sps:$4 sm:$0xff]  }
  0x27   : > { %1571 = vmatpush3.bf16.msra.mxu0 %v1832_v26  ;;  %v1906_v13 = vld [vmem:[%s2090_s29 + $0x16c] ss:$16 sps:$4 sm:$0xff]   ;;  %v1908_v14 = vld [vmem:[%s2090_s29 + $0x160] ss:$16 sps:$4 sm:$0xff]   ;;  %v1909_v15 = vld [vmem:[%s2090_s29 + $0x168] ss:$16 sps:$4 sm:$0xff]  }
  0x28   : > { %1683 = vmatpush3.bf16.msra.mxu1 %v1833_v27  ;;  %1572 = vmatprep.subr.bf16.mxu0 %v1834_v28  ;;  %v1910_v16 = vld [vmem:[%s2090_s29 + $0x184] ss:$16 sps:$4 sm:$0xff]   ;;  %v1912_v17 = vld [vmem:[%s2090_s29 + $0x18c] ss:$16 sps:$4 sm:$0xff]   ;;  %v1914_v18 = vld [vmem:[%s2090_s29 + $0x180] ss:$16 sps:$4 sm:$0xff]  }
  0x29   : > { %1684 = vmatprep.subr.bf16.mxu1 %v1835_v29  ;;  %v1915_v19 = vld [vmem:[%s2090_s29 + $0x188] ss:$16 sps:$4 sm:$0xff]   ;;  %v1916_v20 = vld [vmem:[%s2090_s29 + $0x1a4] ss:$16 sps:$4 sm:$0xff]   ;;  %v1918_v21 = vld [vmem:[%s2090_s29 + $0x1ac] ss:$16 sps:$4 sm:$0xff]  }
  0x2a   : > { %v1920_v22 = vld [vmem:[%s2090_s29 + $0x1a0] ss:$16 sps:$4 sm:$0xff]   ;;  %v1921_v23 = vld [vmem:[%s2090_s29 + $0x1a8] ss:$16 sps:$4 sm:$0xff]   ;;  %v1922_v24 = vld [vmem:[%s2090_s29 + $0x1c4] ss:$16 sps:$4 sm:$0xff]  }
  0x2b   : > { %1573 = vmatpush3.bf16.msra.mxu0 %v1836_v30  ;;  %v1924_v25 = vld [vmem:[%s2090_s29 + $0x1cc] ss:$16 sps:$4 sm:$0xff]   ;;  %v1926_v26 = vld [vmem:[%s2090_s29 + $0x1c0] ss:$16 sps:$4 sm:$0xff]   ;;  %v1927_v27 = vld [vmem:[%s2090_s29 + $0x1c8] ss:$16 sps:$4 sm:$0xff]  }
  0x2c   : > { %1685 = vmatpush3.bf16.msra.mxu1 %v1837_v31  ;;  %v1928_v28 = vld [vmem:[%s2090_s29 + $0x1e4] ss:$16 sps:$4 sm:$0xff]   ;;  %v1930_v29 = vld [vmem:[%s2090_s29 + $0x1ec] ss:$16 sps:$4 sm:$0xff]   ;;  %v1932_v30 = vld [vmem:[%s2090_s29 + $0x1e0] ss:$16 sps:$4 sm:$0xff]  }
  0x2d   : > { %v1933_v31 = vld [vmem:[%s2090_s29 + $0x1e8] ss:$16 sps:$4 sm:$0xff]  }
  0x2e   : > { %942 = vmatmul.mubr.bf16.vlgmr.msra.gmra.mxu0 %v1838_v32 }
  0x2f   : > { %1103 = vmatmul.mubr.bf16.vlgmr.msra.gmra.mxu1 %v1841_v34  ;;  %949 = vmatprep.mubr.bf16.mxu0 %v1844_v36 }
  0x30   : > { %1110 = vmatprep.mubr.bf16.mxu1 %v1846_v37 }
  0x36   : > { %950 = vmatmul.mubr.bf16.gmra.mxu0 %v1848_v38 }
  0x37   : > { %1111 = vmatmul.mubr.bf16.gmra.mxu1 %v1849_v39  ;;  %957 = vmatprep.mubr.bf16.mxu0 %v1850_v40 }
  0x38   : > { %1118 = vmatprep.mubr.bf16.mxu1 %v1852_v41 }
  0x3e   : > { %958 = vmatmul.mubr.bf16.gmra.mxu0 %v1854_v42 }
  0x3f   : > { %1119 = vmatmul.mubr.bf16.gmra.mxu1 %v1855_v43  ;;  %965 = vmatprep.mubr.bf16.mxu0 %v1856_v44 }
  0x40   : > { %1126 = vmatprep.mubr.bf16.mxu1 %v1858_v45 }
  0x46   : > { %966 = vmatmul.mubr.bf16.gmra.mxu0 %v1860_v46 }
  0x47   : > { %1127 = vmatmul.mubr.bf16.gmra.mxu1 %v1861_v47  ;;  %973 = vmatprep.mubr.bf16.mxu0 %v1862_v48 }
  0x48   : > { %1134 = vmatprep.mubr.bf16.mxu1 %v1864_v49 }
  0x4e   : > { %974 = vmatmul.mubr.bf16.gmra.mxu0 %v1866_v50 }
  0x4f   : > { %1135 = vmatmul.mubr.bf16.gmra.mxu1 %v1867_v51  ;;  %981 = vmatprep.mubr.bf16.mxu0 %v1868_v52 }
  0x50   : > { %1142 = vmatprep.mubr.bf16.mxu1 %v1870_v53 }
  0x56   : > { %982 = vmatmul.mubr.bf16.gmra.mxu0 %v1872_v54 }
  0x57   : > { %1143 = vmatmul.mubr.bf16.gmra.mxu1 %v1873_v55  ;;  %989 = vmatprep.mubr.bf16.mxu0 %v1874_v56 }
  0x58   : > { %1150 = vmatprep.mubr.bf16.mxu1 %v1876_v57 }
  0x5e   : > { %990 = vmatmul.mubr.bf16.gmra.mxu0 %v1878_v58 }
  0x5f   : > { %1151 = vmatmul.mubr.bf16.gmra.mxu1 %v1879_v59  ;;  %997 = vmatprep.mubr.bf16.mxu0 %v1880_v60 }
  0x60   : > { %1158 = vmatprep.mubr.bf16.mxu1 %v1882_v61 }
  0x66   : > { %998 = vmatmul.mubr.bf16.gmra.mxu0 %v1884_v62 }
  0x67   : > { %1159 = vmatmul.mubr.bf16.gmra.mxu1 %v1885_v63  ;;  %1005 = vmatprep.mubr.bf16.mxu0 %v1886_v0 }
  0x68   : > { %1166 = vmatprep.mubr.bf16.mxu1 %v1888_v1 }
  0x6e   : > { %1006 = vmatmul.mubr.bf16.gmra.mxu0 %v1890_v2 }
  0x6f   : > { %1167 = vmatmul.mubr.bf16.gmra.mxu1 %v1891_v3  ;;  %1013 = vmatprep.mubr.bf16.mxu0 %v1892_v4 }
  0x70   : > { %1174 = vmatprep.mubr.bf16.mxu1 %v1894_v5 }
  0x76   : > { %1014 = vmatmul.mubr.bf16.gmra.mxu0 %v1896_v6 }
  0x77   : > { %1175 = vmatmul.mubr.bf16.gmra.mxu1 %v1897_v7  ;;  %1021 = vmatprep.mubr.bf16.mxu0 %v1898_v8 }
  0x78   : > { %1182 = vmatprep.mubr.bf16.mxu1 %v1900_v9 }
  0x7e   : > { %1022 = vmatmul.mubr.bf16.gmra.mxu0 %v1902_v10 }
  0x7f   : > { %1183 = vmatmul.mubr.bf16.gmra.mxu1 %v1903_v11  ;;  %1029 = vmatprep.mubr.bf16.mxu0 %v1904_v12 }
  0x80   : > { %1190 = vmatprep.mubr.bf16.mxu1 %v1906_v13 }
  0x86   : > { %1030 = vmatmul.mubr.bf16.gmra.mxu0 %v1908_v14 }
  0x87   : > { %1191 = vmatmul.mubr.bf16.gmra.mxu1 %v1909_v15  ;;  %1037 = vmatprep.mubr.bf16.mxu0 %v1910_v16 }
  0x88   : > { %1198 = vmatprep.mubr.bf16.mxu1 %v1912_v17 }
  0x8e   : > { %1038 = vmatmul.mubr.bf16.gmra.mxu0 %v1914_v18 }
  0x8f   : > { %1199 = vmatmul.mubr.bf16.gmra.mxu1 %v1915_v19  ;;  %1045 = vmatprep.mubr.bf16.mxu0 %v1916_v20 }
  0x90   : > { %1206 = vmatprep.mubr.bf16.mxu1 %v1918_v21 }
  0x96   : > { %1046 = vmatmul.mubr.bf16.gmra.mxu0 %v1920_v22 }
  0x97   : > { %1207 = vmatmul.mubr.bf16.gmra.mxu1 %v1921_v23  ;;  %1053 = vmatprep.mubr.bf16.mxu0 %v1922_v24 }
  0x98   : > { %1214 = vmatprep.mubr.bf16.mxu1 %v1924_v25 }
  0x9e   : > { %1054 = vmatmul.mubr.bf16.gmra.mxu0 %v1926_v26 }
  0x9f   : > { %1215 = vmatmul.mubr.bf16.gmra.mxu1 %v1927_v27  ;;  %1061 = vmatprep.mubr.bf16.mxu0 %v1928_v28 }
  0xa0   : > { %1222 = vmatprep.mubr.bf16.mxu1 %v1930_v29 }
  0xa6   : > { %1062 = vmatmul.mubr.bf16.gmra.mxu0 %v1932_v30 }
  0xa7   : > { %1223 = vmatmul.mubr.bf16.gmra.mxu1 %v1933_v31 }
  0xee   : > { %v1574_v32 = vpop.f32.mrf.mxu0 }
  0xef   : > { %v1686_v33 = vpop.f32.mrf.mxu1 }
  0xf0   : > { %v1575_v34 = vpop.f32.mrf.mxu0 }
  0xf1   : > { %v1576_v35 = vadd.f32 %v1575_v34, %v1574_v32  ;;  %v1687_v36 = vpop.f32.mrf.mxu1 }
  0xf2   : > { %v1688_v37 = vadd.f32 %v1687_v36, %v1686_v33  ;;  %v1577_v38 = vpop.f32.mrf.mxu0 }
  0xf3   : > { %v1689_v39 = vpop.f32.mrf.mxu1 }
  0xf4   : > { %v1105_v40 = vadd.f32 %v1688_v37, %v1576_v35  ;;  %v1578_v41 = vpop.f32.mrf.mxu0 }
  0xf5   : > { %v1579_v42 = vadd.f32 %v1578_v41, %v1577_v38  ;;  %v1690_v43 = vpop.f32.mrf.mxu1 }
  0xf6   : > { %1330 = vst [vmem:[%s2166_s8] sm:$0xff] %v1105_v40  ;;  %v1691_v44 = vadd.f32 %v1690_v43, %v1689_v39  ;;  %v1580_v45 = vpop.f32.mrf.mxu0 }
  0xf7   : > { %v1692_v46 = vpop.f32.mrf.mxu1 }
  0xf8   : > { %v1108_v47 = vadd.f32 %v1691_v44, %v1579_v42  ;;  %v1581_v48 = vpop.f32.mrf.mxu0 }
  0xf9   : > { %v1582_v49 = vadd.f32 %v1581_v48, %v1580_v45  ;;  %v1693_v50 = vpop.f32.mrf.mxu1 }
  0xfa   : > { %1331 = vst [vmem:[%s2166_s8 + $0x8] sm:$0xff] %v1108_v47  ;;  %v1694_v51 = vadd.f32 %v1693_v50, %v1692_v46  ;;  %v1583_v52 = vpop.f32.mrf.mxu0 }
  0xfb   : > { %v1695_v53 = vpop.f32.mrf.mxu1 }
  0xfc   : > { %v1113_v54 = vadd.f32 %v1694_v51, %v1582_v49  ;;  %v1584_v55 = vpop.f32.mrf.mxu0 }
  0xfd   : > { %v1585_v56 = vadd.f32 %v1584_v55, %v1583_v52  ;;  %v1696_v57 = vpop.f32.mrf.mxu1 }
  0xfe   : > { %1332 = vst [vmem:[%s2166_s8 + $0x10] sm:$0xff] %v1113_v54  ;;  %v1697_v58 = vadd.f32 %v1696_v57, %v1695_v53  ;;  %v1586_v59 = vpop.f32.mrf.mxu0 }
  0xff   : > { %v1698_v60 = vpop.f32.mrf.mxu1 }
 0x100   : > { %v1116_v61 = vadd.f32 %v1697_v58, %v1585_v56  ;;  %v1587_v62 = vpop.f32.mrf.mxu0 }
 0x101   : > { %v1588_v63 = vadd.f32 %v1587_v62, %v1586_v59  ;;  %v1699_v0 = vpop.f32.mrf.mxu1 }
 0x102   : > { %1333 = vst [vmem:[%s2166_s8 + $0x18] sm:$0xff] %v1116_v61  ;;  %v1700_v1 = vadd.f32 %v1699_v0, %v1698_v60  ;;  %v1589_v2 = vpop.f32.mrf.mxu0 }
 0x103   : > { %v1701_v3 = vpop.f32.mrf.mxu1 }
 0x104   : > { %v1121_v4 = vadd.f32 %v1700_v1, %v1588_v63  ;;  %v1590_v5 = vpop.f32.mrf.mxu0 }
 0x105   : > { %v1591_v6 = vadd.f32 %v1590_v5, %v1589_v2  ;;  %v1702_v7 = vpop.f32.mrf.mxu1 }
 0x106   : > { %1334 = vst [vmem:[%s2166_s8 + $0x20] sm:$0xff] %v1121_v4  ;;  %v1703_v8 = vadd.f32 %v1702_v7, %v1701_v3  ;;  %v1592_v9 = vpop.f32.mrf.mxu0 }
 0x107   : > { %v1704_v10 = vpop.f32.mrf.mxu1 }
 0x108   : > { %v1124_v11 = vadd.f32 %v1703_v8, %v1591_v6  ;;  %v1593_v12 = vpop.f32.mrf.mxu0 }
 0x109   : > { %v1594_v13 = vadd.f32 %v1593_v12, %v1592_v9  ;;  %v1705_v14 = vpop.f32.mrf.mxu1 }
 0x10a   : > { %1335 = vst [vmem:[%s2166_s8 + $0x28] sm:$0xff] %v1124_v11  ;;  %v1706_v15 = vadd.f32 %v1705_v14, %v1704_v10  ;;  %v1595_v16 = vpop.f32.mrf.mxu0 }
 0x10b   : > { %v1707_v17 = vpop.f32.mrf.mxu1 }
 0x10c   : > { %v1129_v18 = vadd.f32 %v1706_v15, %v1594_v13  ;;  %v1596_v19 = vpop.f32.mrf.mxu0 }
 0x10d   : > { %v1597_v20 = vadd.f32 %v1596_v19, %v1595_v16  ;;  %v1708_v21 = vpop.f32.mrf.mxu1 }
 0x10e   : > { %1336 = vst [vmem:[%s2166_s8 + $0x30] sm:$0xff] %v1129_v18  ;;  %v1709_v22 = vadd.f32 %v1708_v21, %v1707_v17  ;;  %v1598_v23 = vpop.f32.mrf.mxu0 }
 0x10f   : > { %v1710_v24 = vpop.f32.mrf.mxu1 }
 0x110   : > { %v1132_v25 = vadd.f32 %v1709_v22, %v1597_v20  ;;  %v1599_v26 = vpop.f32.mrf.mxu0 }
 0x111   : > { %v1600_v27 = vadd.f32 %v1599_v26, %v1598_v23  ;;  %v1711_v28 = vpop.f32.mrf.mxu1 }
 0x112   : > { %1337 = vst [vmem:[%s2166_s8 + $0x38] sm:$0xff] %v1132_v25  ;;  %v1712_v29 = vadd.f32 %v1711_v28, %v1710_v24  ;;  %v1601_v30 = vpop.f32.mrf.mxu0 }
 0x113   : > { %v1713_v31 = vpop.f32.mrf.mxu1 }
 0x114   : > { %v1137_v32 = vadd.f32 %v1712_v29, %v1600_v27  ;;  %v1602_v33 = vpop.f32.mrf.mxu0 }
 0x115   : > { %v1603_v34 = vadd.f32 %v1602_v33, %v1601_v30  ;;  %v1714_v35 = vpop.f32.mrf.mxu1 }
 0x116   : > { %1338 = vst [vmem:[%s2166_s8 + $0x40] sm:$0xff] %v1137_v32  ;;  %v1715_v36 = vadd.f32 %v1714_v35, %v1713_v31  ;;  %v1604_v37 = vpop.f32.mrf.mxu0 }
 0x117   : > { %v1716_v38 = vpop.f32.mrf.mxu1 }
 0x118   : > { %v1140_v39 = vadd.f32 %v1715_v36, %v1603_v34  ;;  %v1605_v40 = vpop.f32.mrf.mxu0 }
 0x119   : > { %v1606_v41 = vadd.f32 %v1605_v40, %v1604_v37  ;;  %v1717_v42 = vpop.f32.mrf.mxu1 }
 0x11a   : > { %1339 = vst [vmem:[%s2166_s8 + $0x48] sm:$0xff] %v1140_v39  ;;  %v1718_v43 = vadd.f32 %v1717_v42, %v1716_v38  ;;  %v1607_v44 = vpop.f32.mrf.mxu0 }
 0x11b   : > { %v1719_v45 = vpop.f32.mrf.mxu1 }
 0x11c   : > { %v1145_v46 = vadd.f32 %v1718_v43, %v1606_v41  ;;  %v1608_v47 = vpop.f32.mrf.mxu0 }
 0x11d   : > { %v1609_v48 = vadd.f32 %v1608_v47, %v1607_v44  ;;  %v1720_v49 = vpop.f32.mrf.mxu1 }
 0x11e   : > { %1340 = vst [vmem:[%s2166_s8 + $0x50] sm:$0xff] %v1145_v46  ;;  %v1721_v50 = vadd.f32 %v1720_v49, %v1719_v45  ;;  %v1610_v51 = vpop.f32.mrf.mxu0 }
 0x11f   : > { %v1722_v52 = vpop.f32.mrf.mxu1 }
 0x120   : > { %v1148_v53 = vadd.f32 %v1721_v50, %v1609_v48  ;;  %v1611_v54 = vpop.f32.mrf.mxu0 }
 0x121   : > { %v1612_v55 = vadd.f32 %v1611_v54, %v1610_v51  ;;  %v1723_v56 = vpop.f32.mrf.mxu1 }
 0x122   : > { %1341 = vst [vmem:[%s2166_s8 + $0x58] sm:$0xff] %v1148_v53  ;;  %v1724_v57 = vadd.f32 %v1723_v56, %v1722_v52  ;;  %v1613_v58 = vpop.f32.mrf.mxu0 }
 0x123   : > { %v1725_v59 = vpop.f32.mrf.mxu1 }
 0x124   : > { %v1153_v60 = vadd.f32 %v1724_v57, %v1612_v55  ;;  %v1614_v61 = vpop.f32.mrf.mxu0 }
 0x125   : > { %v1615_v62 = vadd.f32 %v1614_v61, %v1613_v58  ;;  %v1726_v63 = vpop.f32.mrf.mxu1 }
 0x126   : > { %1342 = vst [vmem:[%s2166_s8 + $0x60] sm:$0xff] %v1153_v60  ;;  %v1727_v0 = vadd.f32 %v1726_v63, %v1725_v59  ;;  %v1616_v1 = vpop.f32.mrf.mxu0 }
 0x127   : > { %v1728_v2 = vpop.f32.mrf.mxu1 }
 0x128   : > { %v1156_v3 = vadd.f32 %v1727_v0, %v1615_v62  ;;  %v1617_v4 = vpop.f32.mrf.mxu0 }
 0x129   : > { %v1618_v5 = vadd.f32 %v1617_v4, %v1616_v1  ;;  %v1729_v6 = vpop.f32.mrf.mxu1 }
 0x12a   : > { %1343 = vst [vmem:[%s2166_s8 + $0x68] sm:$0xff] %v1156_v3  ;;  %v1730_v7 = vadd.f32 %v1729_v6, %v1728_v2  ;;  %v1619_v8 = vpop.f32.mrf.mxu0 }
 0x12b   : > { %v1731_v9 = vpop.f32.mrf.mxu1 }
 0x12c   : > { %v1161_v10 = vadd.f32 %v1730_v7, %v1618_v5  ;;  %v1620_v11 = vpop.f32.mrf.mxu0 }
 0x12d   : > { %v1621_v12 = vadd.f32 %v1620_v11, %v1619_v8  ;;  %v1732_v13 = vpop.f32.mrf.mxu1 }
 0x12e   : > { %1344 = vst [vmem:[%s2166_s8 + $0x70] sm:$0xff] %v1161_v10  ;;  %v1733_v14 = vadd.f32 %v1732_v13, %v1731_v9  ;;  %v1622_v15 = vpop.f32.mrf.mxu0 }
 0x12f   : > { %v1734_v16 = vpop.f32.mrf.mxu1 }
 0x130   : > { %v1164_v17 = vadd.f32 %v1733_v14, %v1621_v12  ;;  %v1623_v18 = vpop.f32.mrf.mxu0 }
 0x131   : > { %v1624_v19 = vadd.f32 %v1623_v18, %v1622_v15  ;;  %v1735_v20 = vpop.f32.mrf.mxu1 }
 0x132   : > { %1345 = vst [vmem:[%s2166_s8 + $0x78] sm:$0xff] %v1164_v17  ;;  %v1736_v21 = vadd.f32 %v1735_v20, %v1734_v16  ;;  %v1625_v22 = vpop.f32.mrf.mxu0 }
 0x133   : > { %v1737_v23 = vpop.f32.mrf.mxu1 }
 0x134   : > { %v1169_v24 = vadd.f32 %v1736_v21, %v1624_v19  ;;  %v1626_v25 = vpop.f32.mrf.mxu0 }
 0x135   : > { %v1627_v26 = vadd.f32 %v1626_v25, %v1625_v22  ;;  %v1738_v27 = vpop.f32.mrf.mxu1 }
 0x136   : > { %1346 = vst [vmem:[%s2166_s8 + $0x80] sm:$0xff] %v1169_v24  ;;  %v1739_v28 = vadd.f32 %v1738_v27, %v1737_v23  ;;  %v1628_v29 = vpop.f32.mrf.mxu0 }
 0x137   : > { %v1740_v30 = vpop.f32.mrf.mxu1 }
 0x138   : > { %v1172_v31 = vadd.f32 %v1739_v28, %v1627_v26  ;;  %v1629_v32 = vpop.f32.mrf.mxu0 }
 0x139   : > { %v1630_v33 = vadd.f32 %v1629_v32, %v1628_v29  ;;  %v1741_v34 = vpop.f32.mrf.mxu1 }
 0x13a   : > { %1347 = vst [vmem:[%s2166_s8 + $0x88] sm:$0xff] %v1172_v31  ;;  %v1742_v35 = vadd.f32 %v1741_v34, %v1740_v30  ;;  %v1631_v36 = vpop.f32.mrf.mxu0 }
 0x13b   : > { %v1743_v37 = vpop.f32.mrf.mxu1 }
 0x13c   : > { %v1177_v38 = vadd.f32 %v1742_v35, %v1630_v33  ;;  %v1632_v39 = vpop.f32.mrf.mxu0 }
 0x13d   : > { %v1633_v40 = vadd.f32 %v1632_v39, %v1631_v36  ;;  %v1744_v41 = vpop.f32.mrf.mxu1 }
 0x13e   : > { %1348 = vst [vmem:[%s2166_s8 + $0x90] sm:$0xff] %v1177_v38  ;;  %v1745_v42 = vadd.f32 %v1744_v41, %v1743_v37  ;;  %v1634_v43 = vpop.f32.mrf.mxu0 }
 0x13f   : > { %v1746_v44 = vpop.f32.mrf.mxu1 }
 0x140   : > { %v1180_v45 = vadd.f32 %v1745_v42, %v1633_v40  ;;  %v1635_v46 = vpop.f32.mrf.mxu0 }
 0x141   : > { %v1636_v47 = vadd.f32 %v1635_v46, %v1634_v43  ;;  %v1747_v48 = vpop.f32.mrf.mxu1 }
 0x142   : > { %1349 = vst [vmem:[%s2166_s8 + $0x98] sm:$0xff] %v1180_v45  ;;  %v1748_v49 = vadd.f32 %v1747_v48, %v1746_v44  ;;  %v1637_v50 = vpop.f32.mrf.mxu0 }
 0x143   : > { %v1749_v51 = vpop.f32.mrf.mxu1 }
 0x144   : > { %v1185_v52 = vadd.f32 %v1748_v49, %v1636_v47  ;;  %v1638_v53 = vpop.f32.mrf.mxu0 }
 0x145   : > { %v1639_v54 = vadd.f32 %v1638_v53, %v1637_v50  ;;  %v1750_v55 = vpop.f32.mrf.mxu1 }
 0x146   : > { %1350 = vst [vmem:[%s2166_s8 + $0xa0] sm:$0xff] %v1185_v52  ;;  %v1751_v56 = vadd.f32 %v1750_v55, %v1749_v51  ;;  %v1640_v57 = vpop.f32.mrf.mxu0 }
 0x147   : > { %v1752_v58 = vpop.f32.mrf.mxu1 }
 0x148   : > { %v1188_v59 = vadd.f32 %v1751_v56, %v1639_v54  ;;  %v1641_v60 = vpop.f32.mrf.mxu0 }
 0x149   : > { %v1642_v61 = vadd.f32 %v1641_v60, %v1640_v57  ;;  %v1753_v62 = vpop.f32.mrf.mxu1 }
 0x14a   : > { %1351 = vst [vmem:[%s2166_s8 + $0xa8] sm:$0xff] %v1188_v59  ;;  %v1754_v63 = vadd.f32 %v1753_v62, %v1752_v58  ;;  %v1643_v0 = vpop.f32.mrf.mxu0 }
 0x14b   : > { %v1755_v1 = vpop.f32.mrf.mxu1 }
 0x14c   : > { %v1193_v2 = vadd.f32 %v1754_v63, %v1642_v61  ;;  %v1644_v3 = vpop.f32.mrf.mxu0 }
 0x14d   : > { %v1645_v4 = vadd.f32 %v1644_v3, %v1643_v0  ;;  %v1756_v5 = vpop.f32.mrf.mxu1 }
 0x14e   : > { %1352 = vst [vmem:[%s2166_s8 + $0xb0] sm:$0xff] %v1193_v2  ;;  %v1757_v6 = vadd.f32 %v1756_v5, %v1755_v1  ;;  %v1646_v7 = vpop.f32.mrf.mxu0 }
 0x14f   : > { %v1758_v8 = vpop.f32.mrf.mxu1 }
 0x150   : > { %v1196_v9 = vadd.f32 %v1757_v6, %v1645_v4  ;;  %v1647_v10 = vpop.f32.mrf.mxu0 }
 0x151   : > { %v1648_v11 = vadd.f32 %v1647_v10, %v1646_v7  ;;  %v1759_v12 = vpop.f32.mrf.mxu1 }
 0x152   : > { %1353 = vst [vmem:[%s2166_s8 + $0xb8] sm:$0xff] %v1196_v9  ;;  %v1760_v13 = vadd.f32 %v1759_v12, %v1758_v8  ;;  %v1649_v14 = vpop.f32.mrf.mxu0 }
 0x153   : > { %v1761_v15 = vpop.f32.mrf.mxu1 }
 0x154   : > { %v1201_v16 = vadd.f32 %v1760_v13, %v1648_v11  ;;  %v1650_v17 = vpop.f32.mrf.mxu0 }
 0x155   : > { %v1651_v18 = vadd.f32 %v1650_v17, %v1649_v14  ;;  %v1762_v19 = vpop.f32.mrf.mxu1 }
 0x156   : > { %1354 = vst [vmem:[%s2166_s8 + $0xc0] sm:$0xff] %v1201_v16  ;;  %v1763_v20 = vadd.f32 %v1762_v19, %v1761_v15  ;;  %v1652_v21 = vpop.f32.mrf.mxu0 }
 0x157   : > { %v1764_v22 = vpop.f32.mrf.mxu1 }
 0x158   : > { %v1204_v23 = vadd.f32 %v1763_v20, %v1651_v18  ;;  %v1653_v24 = vpop.f32.mrf.mxu0 }
 0x159   : > { %v1654_v25 = vadd.f32 %v1653_v24, %v1652_v21  ;;  %v1765_v26 = vpop.f32.mrf.mxu1 }
 0x15a   : > { %1355 = vst [vmem:[%s2166_s8 + $0xc8] sm:$0xff] %v1204_v23  ;;  %v1766_v27 = vadd.f32 %v1765_v26, %v1764_v22  ;;  %v1655_v28 = vpop.f32.mrf.mxu0 }
 0x15b   : > { %v1767_v29 = vpop.f32.mrf.mxu1 }
 0x15c   : > { %v1209_v30 = vadd.f32 %v1766_v27, %v1654_v25  ;;  %v1656_v31 = vpop.f32.mrf.mxu0 }
 0x15d   : > { %v1657_v32 = vadd.f32 %v1656_v31, %v1655_v28  ;;  %v1768_v33 = vpop.f32.mrf.mxu1 }
 0x15e   : > { %1356 = vst [vmem:[%s2166_s8 + $0xd0] sm:$0xff] %v1209_v30  ;;  %v1769_v34 = vadd.f32 %v1768_v33, %v1767_v29  ;;  %v1658_v35 = vpop.f32.mrf.mxu0 }
 0x15f   : > { %v1770_v36 = vpop.f32.mrf.mxu1 }
 0x160   : > { %v1212_v37 = vadd.f32 %v1769_v34, %v1657_v32  ;;  %v1659_v38 = vpop.f32.mrf.mxu0 }
 0x161   : > { %v1660_v39 = vadd.f32 %v1659_v38, %v1658_v35  ;;  %v1771_v40 = vpop.f32.mrf.mxu1 }
 0x162   : > { %1357 = vst [vmem:[%s2166_s8 + $0xd8] sm:$0xff] %v1212_v37  ;;  %v1772_v41 = vadd.f32 %v1771_v40, %v1770_v36  ;;  %v1661_v42 = vpop.f32.mrf.mxu0 }
 0x163   : > { %v1773_v43 = vpop.f32.mrf.mxu1 }
 0x164   : > { %v1217_v44 = vadd.f32 %v1772_v41, %v1660_v39  ;;  %v1662_v45 = vpop.f32.mrf.mxu0 }
 0x165   : > { %v1663_v46 = vadd.f32 %v1662_v45, %v1661_v42  ;;  %v1774_v47 = vpop.f32.mrf.mxu1 }
 0x166   : > { %1358 = vst [vmem:[%s2166_s8 + $0xe0] sm:$0xff] %v1217_v44  ;;  %v1775_v48 = vadd.f32 %v1774_v47, %v1773_v43  ;;  %v1664_v49 = vpop.f32.mrf.mxu0 }
 0x167   : > { %v1776_v50 = vpop.f32.mrf.mxu1 }
 0x168   : > { %v1220_v51 = vadd.f32 %v1775_v48, %v1663_v46  ;;  %v1665_v52 = vpop.f32.mrf.mxu0 }
 0x169   : > { %v1666_v53 = vadd.f32 %v1665_v52, %v1664_v49  ;;  %v1777_v54 = vpop.f32.mrf.mxu1 }
 0x16a   : > { %1359 = vst [vmem:[%s2166_s8 + $0xe8] sm:$0xff] %v1220_v51  ;;  %v1778_v55 = vadd.f32 %v1777_v54, %v1776_v50  ;;  %v1667_v56 = vpop.f32.mrf.mxu0 }
 0x16b   : > { %v1779_v57 = vpop.f32.mrf.mxu1 }
 0x16c   : > { %v1225_v58 = vadd.f32 %v1778_v55, %v1666_v53  ;;  %v1668_v59 = vpop.f32.mrf.mxu0 }
 0x16d   : > { %v1669_v60 = vadd.f32 %v1668_v59, %v1667_v56  ;;  %v1780_v61 = vpop.f32.mrf.mxu1 }
 0x16e   : > { %1360 = vst [vmem:[%s2166_s8 + $0xf0] sm:$0xff] %v1225_v58  ;;  %v1781_v62 = vadd.f32 %v1780_v61, %v1779_v57 }
 0x170   : > { %v1228_v63 = vadd.f32 %v1781_v62, %v1669_v60 }
 0x172   : > { %1361 = vst [vmem:[%s2166_s8 + $0xf8] sm:$0xff] %v1228_v63 }
 0x173 PF: > { %s12_s11 = sadd.s32 1, %s1956_s11   ;;  %s2212_s9 = smov %s1952_s10 }
 0x174   : > { %p9_p5 = scmp.ge.s32.totalorder %s12_s11, 4   ;;  %s2213_s10 = smov %s2215_s12 }
 0x176   :  { %11 = sbr.rel (!%p9_p5) target bundleno = 2 (0x2), region = 69 }

</bundles_post_ra>
